<compile_context>
chip_gen: v7x
topology: tpu7x:2x2x1
jax: 0.10.0
libtpu: 0.0.40
codegen_flags: <defaults>
</compile_context>

<pallas_src>
import jax
import jax.numpy as jnp
from jax.experimental import pallas as pl
from jax.experimental.pallas import tpu as pltpu

FEAT = 256


def _relu6_gated_linear_kernel(x_ref, w_ref, o_ref):
    # x_ref: (TM, 256) bf16, w_ref: (256, 256) bf16 in (in, out) layout.
    # MXU matmul, f32 accumulate.
    v1 = jnp.dot(x_ref[...], w_ref[...], preferred_element_type=jnp.float32)
    # v1 * relu6(v1) / 6   (the module's outer clamp is mathematically redundant)
    relu6 = jnp.minimum(jnp.maximum(v1, 0.0), 6.0)
    o_ref[...] = (v1 * relu6 * (1.0 / 6.0)).astype(o_ref.dtype)


def prepare_weight(weight_out_in):
    """One-time parameter prep (NOT per call): PyTorch (out, in) -> (in, out), bf16."""
    return jnp.asarray(weight_out_in).T.astype(jnp.bfloat16)


def model_forward(x, w_prepared):
    """x: (256,) or (B, 256) f32; w_prepared: (256, 256) bf16 in (in, out) layout."""
    squeeze = x.ndim == 1
    x2d = x.reshape(1, FEAT) if squeeze else x
    B = x2d.shape[0]

    # Tile the batch: sublane-fill (multiple of 8), cap the tile at 128 rows.
    if B >= 128:
        tm = 128
    else:
        tm = max(8, ((B + 7) // 8) * 8)
    b_pad = ((B + tm - 1) // tm) * tm
    if b_pad != B:
        x2d = jnp.pad(x2d, ((0, b_pad - B), (0, 0)))
    x_bf16 = x2d.astype(jnp.bfloat16)

    cost = pl.CostEstimate(
        flops=2 * b_pad * FEAT * FEAT,
        transcendentals=0,
        bytes_accessed=FEAT * FEAT * 2 + b_pad * FEAT * 2 + b_pad * FEAT * 4,
    )

    out = pl.pallas_call(
        _relu6_gated_linear_kernel,
        out_shape=jax.ShapeDtypeStruct((b_pad, FEAT), jnp.float32),
        grid=(b_pad // tm,),
        in_specs=[
            pl.BlockSpec((tm, FEAT), lambda i: (i, 0)),
            # Same block for every grid step -> weight stays VMEM-resident,
            # DMA'd from HBM once.
            pl.BlockSpec((FEAT, FEAT), lambda i: (0, 0)),
        ],
        out_specs=pl.BlockSpec((tm, FEAT), lambda i: (i, 0)),
        compiler_params=pltpu.CompilerParams(dimension_semantics=("parallel",)),
        cost_estimate=cost,
    )(x_bf16, w_prepared)

    out = out[:B]
    return out.reshape(FEAT) if squeeze else out


def _reference(x, weight_out_in):
    v1 = x @ weight_out_in.T
    v2 = v1 * jnp.clip(jnp.minimum(jnp.maximum(v1, 0.0), 6.0), 0.0, 6.0)
    return v2 / 6.0


if __name__ == "__main__":
    key = jax.random.PRNGKey(0)
    kx, kw = jax.random.split(key)
    x1 = jax.random.normal(kx, (FEAT,), dtype=jnp.float32)
    # Deterministic "Linear(256, 256, bias=False)" weight (PyTorch (out, in) layout)
    bound = 1.0 / (FEAT ** 0.5)
    weight = jax.random.uniform(
        kw, (FEAT, FEAT), dtype=jnp.float32, minval=-bound, maxval=bound
    )

    # One-time param prep (transpose + bf16 cast), amortized across all calls.
    w_prep = prepare_weight(weight)

    # 1) Module-native single-vector forward (matches the PyTorch spec).
    out = model_forward(x1, w_prep)
    jax.block_until_ready(out)
    ref = _reference(x1, weight)
    assert out.shape == (FEAT,)
    # bf16 weights -> loosened tolerance (per review)
    assert jnp.allclose(out, ref, atol=2e-2, rtol=2e-2)

    # 2) Batched forward (amortizes the weight DMA, fills the MXU M dim).
    xb = jax.random.normal(jax.random.PRNGKey(1), (128, FEAT), dtype=jnp.float32)
    outb = model_forward(xb, w_prep)
    jax.block_until_ready(outb)
    refb = _reference(xb, weight)
    assert outb.shape == (128, FEAT)
    assert jnp.allclose(outb, refb, atol=2e-2, rtol=2e-2)

    print("KERNEL_OK")
</pallas_src>

<mosaic_0001>
module attributes {stable_mosaic.version = 11 : i64} {
  func.func @_relu6_gated_linear_kernel(%arg0: i32, %arg1: memref<8x256xbf16, #tpu.memory_space<vmem>>, %arg2: memref<256x256xbf16, #tpu.memory_space<vmem>>, %arg3: memref<8x256xf32, #tpu.memory_space<vmem>>) attributes {dimension_semantics = [#tpu.dimension_semantics<parallel>], iteration_bounds = array<i64: 1>, scalar_prefetch = 0 : i64, scratch_operands = 0 : i64, tpu.core_type = #tpu.core_type<tc>, window_params = [{transform_indices = @transform_0, window_bounds = array<i64: 8, 256>}, {pipeline_mode = #tpu.pipeline_mode<synchronous>, transform_indices = @transform_1, window_bounds = array<i64: 256, 256>}, {transform_indices = @transform_2, window_bounds = array<i64: 8, 256>}]} {
    %c0 = arith.constant 0 : index
    %c0_0 = arith.constant 0 : index
    %0 = vector.load %arg1[%c0, %c0_0] : memref<8x256xbf16, #tpu.memory_space<vmem>>, vector<8x256xbf16>
    %c0_1 = arith.constant 0 : index
    %c0_2 = arith.constant 0 : index
    %1 = vector.load %arg2[%c0_1, %c0_2] : memref<256x256xbf16, #tpu.memory_space<vmem>>, vector<256x256xbf16>
    %cst = arith.constant dense<0.000000e+00> : vector<8x256xf32>
    %2 = tpu.matmul %0, %1, %cst {dimension_numbers = #tpu.dot_dimension_numbers<[1], [0], [0], [1], [0, 0, 1, 1], [], []>} : vector<8x256xbf16>, vector<256x256xbf16>, vector<8x256xf32> -> vector<8x256xf32>
    %cst_3 = arith.constant 0.000000e+00 : f32
    %3 = vector.broadcast %cst_3 : f32 to vector<8x256xf32>
    %4 = arith.maximumf %2, %3 : vector<8x256xf32>
    %cst_4 = arith.constant 6.000000e+00 : f32
    %5 = vector.broadcast %cst_4 : f32 to vector<8x256xf32>
    %6 = arith.minimumf %4, %5 : vector<8x256xf32>
    %7 = arith.mulf %2, %6 : vector<8x256xf32>
    %cst_5 = arith.constant 0.166666672 : f32
    %8 = vector.broadcast %cst_5 : f32 to vector<8x256xf32>
    %9 = arith.mulf %7, %8 : vector<8x256xf32>
    %c0_6 = arith.constant 0 : index
    %c0_7 = arith.constant 0 : index
    %10 = vector.load %arg3[%c0_6, %c0_7] : memref<8x256xf32, #tpu.memory_space<vmem>>, vector<8x256xf32>
    tpu.vector_store %arg3[%c0_6, %c0_7], %9 {strides = array<i32>} : memref<8x256xf32, #tpu.memory_space<vmem>>, vector<8x256xf32>,
    return
  }
  func.func @transform_0(%arg0: i32) -> (i32, i32) {
    %c0_i32 = arith.constant 0 : i32
    %c0_i32_0 = arith.constant 0 : i32
    return %arg0, %c0_i32 : i32, i32
  }
  func.func @transform_1(%arg0: i32) -> (i32, i32) {
    %c0_i32 = arith.constant 0 : i32
    %c0_i32_0 = arith.constant 0 : i32
    %c0_i32_1 = arith.constant 0 : i32
    return %c0_i32, %c0_i32_0 : i32, i32
  }
  func.func @transform_2(%arg0: i32) -> (i32, i32) {
    %c0_i32 = arith.constant 0 : i32
    %c0_i32_0 = arith.constant 0 : i32
    return %arg0, %c0_i32 : i32, i32
  }
}

</mosaic_0001>

<bundles_post_ra>
// kernel: tpu_custom_call.1
= control target key start
LH: loop header
LB: loop body
LE: loop exit
PB: predicated region body
PF: predicated region fallthrough
CT: control target
= control target key end

     0   :  { %7 = vsyncpa [#allocation3], 0  ;;  %s529_s0 = inlined_call_operand.hbm [shape: bf16[8,256], index: 0, kind: input, shape index: {}]   ;;  %s530_s1 = inlined_call_operand.hbm [shape: bf16[256,256], index: 1, kind: input, shape index: {}]   ;;  %s531_s2 = inlined_call_operand.hbm [shape: f32[8,256], index: 2, kind: output, shape index: {}]  }
   0x1   :  { %8 = vsyncpa [#allocation6], 0 }
   0x2   :  { %9 = vsyncpa [#allocation4], 0  ;;  %s466_s9 = smov [#allocation2]   ;;  %s467_s11 = smov [#allocation5]  }
   0x3   :  { %s16_s10 = sshll.u32 %s466_s9, 4  ;;  %s25_s12 = sshll.u32 %s467_s11, 4  ;;  %s17_s10 = int_to_ptr.vmem [resolvable:$true] %s16_s10  ;;  %s486_s12 = int_to_ptr.vmem [resolvable:$true] %s25_s12 }
   0x4   :  { %s394_s15 = scalar_lea.hbm %s529_s0, 128 }
   0x5   :  { %p395_p0 = scmp.ne.s32.totalorder %s529_s0, %s394_s15  ;;  %p398_p1 = scmp.lt.u32.totalorder %s394_s15, %s529_s0 }
   0x7   :  { %p400_p2 = pnand %p398_p1, %p395_p0 }
   0x9   :  { %403 = shalt.err (!%p400_p2)
}
   0xa   :  { %s404_s20 = scalar_lea.vmem %s17_s10, 128  ;;  %p409_p4 = scmp.lt.s32.totalorder %s17_s10, %s17_s10 }
   0xb   :  { %p405_p3 = scmp.ne.s32.totalorder %s17_s10, %s404_s20  ;;  %p410_p5 = scmp.lt.s32.totalorder %s404_s20, %s404_s20 }
   0xd   :  { %p411_p6 = por %p410_p5, %p409_p4 }
   0xf   :  { %p412_p7 = pnand %p411_p6, %p405_p3 }
  0x11   :  { %415 = shalt.err (!%p412_p7)
}
  0x12   :  { %19 = dma.hbm_to_vmem [thread:$0]  %s529_s0, 128, %s17_s10, [#allocation3]  }
  0x13   :  { %s416_s25 = scalar_lea.hbm %s530_s1, 4096 }
  0x14   :  { %p417_p8 = scmp.ne.s32.totalorder %s530_s1, %s416_s25  ;;  %p420_p9 = scmp.lt.u32.totalorder %s416_s25, %s530_s1 }
  0x16   :  { %p422_p10 = pnand %p420_p9, %p417_p8 }
  0x18   :  { %425 = shalt.err (!%p422_p10)
}
  0x19   :  { %s426_s30 = scalar_lea.vmem %s486_s12, 4096  ;;  %p431_p12 = scmp.lt.s32.totalorder %s486_s12, %s486_s12 }
  0x1a   :  { %p427_p11 = scmp.ne.s32.totalorder %s486_s12, %s426_s30  ;;  %p432_p13 = scmp.lt.s32.totalorder %s426_s30, %s426_s30 }
  0x1c   :  { %p433_p0 = por %p432_p13, %p431_p12 }
  0x1e   :  { %p434_p1 = pnand %p433_p0, %p427_p11 }
  0x20   :  { %437 = shalt.err (!%p434_p1)
}
  0x21   :  { %s468_s0 = smov 128   ;;  %s469_s3 = smov 8  }
  0x22   :  { %31 = dma.hbm_to_vmem [thread:$0]  %s530_s1, 4096, %s486_s12, [#allocation6], %s468_s0, %s468_s0, %s469_s3  }
  0x23   :  { %460 = dma.done.wait [#allocation3], 128  }
  0x24   :  { %461 = vsyncadd [#allocation3], 4294967168 }
  0x25   :  { %462 = dma.done.wait [#allocation6], 4096  }
  0x26   :  { %463 = vsyncadd [#allocation6], 4294963200  ;;  %v344_v0 = vld [vmem:[#allocation5 + $0x4] ss:$8 sps:$4 sm:$0xff]   ;;  %v346_v1 = vld [vmem:[#allocation5] ss:$8 sps:$4 sm:$0xff]  }
  0x27   :  { %238 = vmatprep.subr.bf16.mxu0 %v344_v0  ;;  %v347_v2 = vld [vmem:[#allocation5 + $0x14] ss:$8 sps:$4 sm:$0xff]   ;;  %v349_v3 = vld [vmem:[#allocation5 + $0x10] ss:$8 sps:$4 sm:$0xff]   ;;  %v350_v4 = vld [vmem:[#allocation5 + $0x24] ss:$8 sps:$4 sm:$0xff]  }
  0x28   :  { %239 = vmatpush1.bf16.msra.mxu0 %v346_v1  ;;  %v352_v5 = vld [vmem:[#allocation5 + $0x20] ss:$8 sps:$4 sm:$0xff]   ;;  %v353_v6 = vld [vmem:[#allocation5 + $0x34] ss:$8 sps:$4 sm:$0xff]   ;;  %v355_v7 = vld [vmem:[#allocation5 + $0x30] ss:$8 sps:$4 sm:$0xff]  }
  0x29   :  { %240 = vmatprep.subr.bf16.mxu0 %v347_v2  ;;  %v356_v8 = vld [vmem:[#allocation5 + $0x44] ss:$8 sps:$4 sm:$0xff]   ;;  %v358_v9 = vld [vmem:[#allocation5 + $0x40] ss:$8 sps:$4 sm:$0xff]   ;;  %v359_v10 = vld [vmem:[#allocation5 + $0x54] ss:$8 sps:$4 sm:$0xff]  }
  0x2a   :  { %v361_v11 = vld [vmem:[#allocation5 + $0x50] ss:$8 sps:$4 sm:$0xff]   ;;  %v362_v12 = vld [vmem:[#allocation5 + $0x64] ss:$8 sps:$4 sm:$0xff]   ;;  %v364_v15 = vld [vmem:[#allocation5 + $0x60] ss:$8 sps:$4 sm:$0xff]  }
  0x2b   :  { %v38_v13 = vld [vmem:[#allocation2] sm:$0xff]  ;;  %v368_v18 = vld [vmem:[#allocation5 + $0x84] ss:$8 sps:$4 sm:$0xff]   ;;  %v370_v19 = vld [vmem:[#allocation5 + $0x80] ss:$8 sps:$4 sm:$0xff]   ;;  %s470_s1 = smov [#allocation7]  }
  0x2c   :  { %241 = vmatpush1.bf16.msra.mxu0 %v349_v3  ;;  %v306_v14 = vcombine.high %v38_v13, %v38_v13  ;;  %v365_v16 = vld [vmem:[#allocation5 + $0x74] ss:$8 sps:$4 sm:$0xff]   ;;  %v367_v17 = vld [vmem:[#allocation5 + $0x70] ss:$8 sps:$4 sm:$0xff]   ;;  %v374_v22 = vld [vmem:[#allocation5 + $0xa4] ss:$8 sps:$4 sm:$0xff]   ;;  %v305_v34 = vcombine.low %v38_v13, %v38_v13 }
  0x2d   :  { %242 = vmatprep.subr.bf16.mxu0 %v350_v4  ;;  %v371_v20 = vld [vmem:[#allocation5 + $0x94] ss:$8 sps:$4 sm:$0xff]   ;;  %v373_v21 = vld [vmem:[#allocation5 + $0x90] ss:$8 sps:$4 sm:$0xff]   ;;  %v376_v23 = vld [vmem:[#allocation5 + $0xa0] ss:$8 sps:$4 sm:$0xff]  }
  0x2e   :  { %270 = vmatprep.mubr.bf16.mxu0 %v306_v14  ;;  %v377_v24 = vld [vmem:[#allocation5 + $0xb4] ss:$8 sps:$4 sm:$0xff]   ;;  %v379_v25 = vld [vmem:[#allocation5 + $0xb0] ss:$8 sps:$4 sm:$0xff]   ;;  %v380_v26 = vld [vmem:[#allocation5 + $0xc4] ss:$8 sps:$4 sm:$0xff]  }
  0x2f   :  { %v382_v27 = vld [vmem:[#allocation5 + $0xc0] ss:$8 sps:$4 sm:$0xff]   ;;  %v383_v28 = vld [vmem:[#allocation5 + $0xd4] ss:$8 sps:$4 sm:$0xff]   ;;  %v385_v29 = vld [vmem:[#allocation5 + $0xd0] ss:$8 sps:$4 sm:$0xff]  }
  0x30   :  { %243 = vmatpush1.bf16.msra.mxu0 %v352_v5  ;;  %v386_v30 = vld [vmem:[#allocation5 + $0xe4] ss:$8 sps:$4 sm:$0xff]   ;;  %v388_v31 = vld [vmem:[#allocation5 + $0xe0] ss:$8 sps:$4 sm:$0xff]   ;;  %v389_v32 = vld [vmem:[#allocation5 + $0xf4] ss:$8 sps:$4 sm:$0xff]  }
  0x31   :  { %244 = vmatprep.subr.bf16.mxu0 %v353_v6  ;;  %v391_v33 = vld [vmem:[#allocation5 + $0xf0] ss:$8 sps:$4 sm:$0xff]   ;;  %s295_s6 = sshll.u32 %s470_s1, 4  ;;  %s296_s6 = int_to_ptr.vmem [resolvable:$true] %s295_s6 }
  0x32   :  { %s438_s7 = scalar_lea.vmem %s296_s6, 256  ;;  %p443_p3 = scmp.lt.s32.totalorder %s296_s6, %s296_s6 }
  0x33   :  { %p439_p2 = scmp.ne.s32.totalorder %s296_s6, %s438_s7  ;;  %p444_p4 = scmp.lt.s32.totalorder %s438_s7, %s438_s7 }
  0x34   :  { %245 = vmatpush1.bf16.msra.mxu0 %v355_v7 }
  0x35   :  { %246 = vmatprep.subr.bf16.mxu0 %v356_v8  ;;  %p445_p5 = por %p444_p4, %p443_p3 }
  0x37   :  { %p446_p6 = pnand %p445_p5, %p439_p2 }
  0x38   :  { %247 = vmatpush1.bf16.msra.mxu0 %v358_v9 }
  0x39   :  { %248 = vmatprep.subr.bf16.mxu0 %v359_v10 }
  0x3c   :  { %249 = vmatpush1.bf16.msra.mxu0 %v361_v11 }
  0x3d   :  { %250 = vmatprep.subr.bf16.mxu0 %v362_v12 }
  0x40   :  { %251 = vmatpush1.bf16.msra.mxu0 %v364_v15 }
  0x41   :  { %252 = vmatprep.subr.bf16.mxu0 %v365_v16 }
  0x44   :  { %253 = vmatpush1.bf16.msra.mxu0 %v367_v17 }
  0x45   :  { %254 = vmatprep.subr.bf16.mxu0 %v368_v18 }
  0x48   :  { %255 = vmatpush1.bf16.msra.mxu0 %v370_v19 }
  0x49   :  { %256 = vmatprep.subr.bf16.mxu0 %v371_v20 }
  0x4c   :  { %257 = vmatpush1.bf16.msra.mxu0 %v373_v21 }
  0x4d   :  { %258 = vmatprep.subr.bf16.mxu0 %v374_v22 }
  0x50   :  { %259 = vmatpush1.bf16.msra.mxu0 %v376_v23 }
  0x51   :  { %260 = vmatprep.subr.bf16.mxu0 %v377_v24 }
  0x54   :  { %261 = vmatpush1.bf16.msra.mxu0 %v379_v25 }
  0x55   :  { %262 = vmatprep.subr.bf16.mxu0 %v380_v26 }
  0x58   :  { %263 = vmatpush1.bf16.msra.mxu0 %v382_v27 }
  0x59   :  { %264 = vmatprep.subr.bf16.mxu0 %v383_v28 }
  0x5c   :  { %265 = vmatpush1.bf16.msra.mxu0 %v385_v29 }
  0x5d   :  { %266 = vmatprep.subr.bf16.mxu0 %v386_v30 }
  0x60   :  { %267 = vmatpush1.bf16.msra.mxu0 %v388_v31 }
  0x61   :  { %268 = vmatprep.subr.bf16.mxu0 %v389_v32 }
  0x64   :  { %269 = vmatpush1.bf16.msra.mxu0 %v391_v33 }
  0x67   :  { %271 = vmatmul.mubr.bf16.vlgmr.msra.gmra.mrb[0].mxu0 %v305_v34 }
 0x13a   :  { %v272_v35 = vpop.f32.mrb[0].mxu0 }
 0x13b   :  { %v279_v36 = vmax.f32 %v272_v35, 0.0  ;;  %v274_v37 = vpop.f32.mrb[1].mxu0 }
 0x13c   :  { %v280_v38 = vmax.f32 %v274_v37, 0.0  ;;  %v276_v39 = vpop.f32.mrb[2].mxu0 }
 0x13d   :  { %v281_v40 = vmin.f32 %v279_v36, 6.0  ;;  %v277_v41 = vpop.f32.mrb[3].mxu0 }
 0x13e   :  { %v282_v42 = vmin.f32 %v280_v38, 6.0 }
 0x13f   :  { %v283_v43 = vmul.f32 %v281_v40, %v272_v35 }
 0x140   :  { %v284_v44 = vmul.f32 %v282_v42, %v274_v37 }
 0x141   :  { %v285_v45 = vmul.f32 0.16666667, %v283_v43 }
 0x142   :  { %v286_v46 = vmul.f32 0.16666667, %v284_v44 }
 0x143   :  { %287 = vst [vmem:[#allocation7] sm:$0xff] %v285_v45 }
 0x144   :  { %288 = vst [vmem:[#allocation7 + $0x8] sm:$0xff] %v286_v46 }
 0x145   :  { %449 = shalt.err (!%p446_p6)
}
 0x146   :  { %s450_s10 = scalar_lea.hbm %s531_s2, 256 }
 0x147   :  { %p451_p7 = scmp.ne.s32.totalorder %s531_s2, %s450_s10  ;;  %p454_p8 = scmp.lt.u32.totalorder %s450_s10, %s531_s2 }
 0x149   :  { %p456_p9 = pnand %p454_p8, %p451_p7 }
 0x14b   :  { %459 = shalt.err (!%p456_p9)
}
 0x14c   :  { %298 = dma.vmem_to_hbm [thread:$0]  %s296_s6, 256, %s531_s2, [#allocation4]  }
 0x14d   :  { %464 = dma.done.wait [#allocation4], 256  }
 0x14e   :  { %465 = vsyncadd [#allocation4], 4294967040 }
 0x14f   :  { %302 = vsyncpa [#allocation3], 1 }
 0x150   :  { %303 = vsyncpa [#allocation6], 1 }
 0x151   :  { %304 = vsyncpa [#allocation4], 1 }

</bundles_post_ra>
